<compile_context>
chip_gen: v7x
topology: tpu7x:2x2x1
jax: 0.10.0
libtpu: 0.0.40
codegen_flags: <defaults>
</compile_context>

<pallas_src>
import math

import jax
import jax.numpy as jnp
from jax.experimental import pallas as pl
from jax.experimental.pallas import tpu as pltpu

LANE = 128
# Conservative total-VMEM budget: v7x has 64 MiB physical per TC; v5e/v6e 128.
VMEM_BUDGET = 40 * 1024 * 1024


def _ceil_to(x, m):
    return ((x + m - 1) // m) * m


# ----------------------------- Pallas kernels -----------------------------

def gnfe_rowslab_kernel(a_ref, xw_ref, b_ref, o_ref):
    """1-D grid over row slabs: o = relu(A_norm[i-slab, :] @ XW + b).

    XW (= X @ W, bf16, lane-padded) and bias have constant index maps so they
    are DMA'd once and stay resident; only the dominant O(N^2) bf16 A stream
    is pipelined.  No accumulator / reduction bookkeeping needed."""
    acc = jnp.dot(a_ref[...], xw_ref[...], preferred_element_type=jnp.float32)
    o_ref[...] = jnp.maximum(acc + b_ref[...], 0.0).astype(o_ref.dtype)


def gnfe_reduction_kernel(a_ref, xw_ref, b_ref, o_ref, acc_ref):
    """2-D grid fallback for huge graphs: accumulate A_norm @ XW over k tiles,
    fused bias + ReLU epilogue on the last k step."""
    k = pl.program_id(1)

    @pl.when(k == 0)
    def _():
        acc_ref[...] = jnp.zeros_like(acc_ref)

    acc_ref[...] += jnp.dot(a_ref[...], xw_ref[...],
                            preferred_element_type=jnp.float32)

    @pl.when(k == pl.num_programs(1) - 1)
    def _():
        o_ref[...] = jnp.maximum(acc_ref[...] + b_ref[...],
                                 0.0).astype(o_ref.dtype)


# ------------------------------ tile planning ------------------------------

def _vmem_rowslab_bytes(tm, n_pad, cout_pad):
    a = 2 * tm * n_pad * 2            # bf16 A row slab, double buffered
    xw = 2 * n_pad * cout_pad * 2     # resident XW (budgeted at 2x buffers)
    b = 2 * cout_pad * 4
    o = 2 * tm * cout_pad * 4
    return a + xw + b + o


def _vmem_reduction_bytes(tm, tk, n_pad, cout_pad):
    a = 2 * tm * tk * 2
    xw = 2 * tk * cout_pad * 2
    b = 2 * cout_pad * 4
    o = 2 * tm * cout_pad * 4
    acc = tm * cout_pad * 4
    return a + xw + b + o + acc


def _plan_rowslab(n, cout_pad, budget=VMEM_BUDGET):
    """Largest row tile that keeps >= 2 (even) row tiles and fits VMEM."""
    n_lane = _ceil_to(n, LANE)
    for tm in (1024, 512, 256, 128, 64, 32, 16, 8):
        if 2 * tm > n_lane and tm > 8:
            continue  # would massively over-pad rows just to get 2 tiles
        n_pad = _ceil_to(n, math.lcm(2 * tm, LANE))
        if _vmem_rowslab_bytes(tm, n_pad, cout_pad) <= budget:
            return tm, n_pad
    return None


def _plan_reduction(n, cout_pad, tm=None, tk=None):
    tm = tm or 256
    tk = tk or 512
    n_pad = _ceil_to(n, math.lcm(2 * tm, tk, LANE))
    return tm, tk, n_pad


# ------------------------------ pallas calls -------------------------------

def _call_rowslab(a, xw, b, n_pad, cout_pad, tm):
    grid = (n_pad // tm,)
    vmem = min(max(32 * 1024 * 1024,
                   _vmem_rowslab_bytes(tm, n_pad, cout_pad) + (4 << 20)),
               60 * 1024 * 1024)
    return pl.pallas_call(
        gnfe_rowslab_kernel,
        out_shape=jax.ShapeDtypeStruct((n_pad, cout_pad), jnp.float32),
        grid_spec=pltpu.PrefetchScalarGridSpec(
            num_scalar_prefetch=0,
            grid=grid,
            in_specs=[
                pl.BlockSpec((tm, n_pad), lambda i: (i, 0)),        # A row slab
                pl.BlockSpec((n_pad, cout_pad), lambda i: (0, 0)),  # XW resident
                pl.BlockSpec((1, cout_pad), lambda i: (0, 0)),      # bias
            ],
            out_specs=pl.BlockSpec((tm, cout_pad), lambda i: (i, 0)),
        ),
        compiler_params=pltpu.CompilerParams(
            dimension_semantics=("parallel",),
            vmem_limit_bytes=vmem,
        ),
    )(a, xw, b)


def _call_reduction(a, xw, b, n_pad, cout_pad, tm, tk):
    grid = (n_pad // tm, n_pad // tk)
    vmem = min(max(32 * 1024 * 1024,
                   _vmem_reduction_bytes(tm, tk, n_pad, cout_pad) + (4 << 20)),
               60 * 1024 * 1024)
    return pl.pallas_call(
        gnfe_reduction_kernel,
        out_shape=jax.ShapeDtypeStruct((n_pad, cout_pad), jnp.float32),
        grid_spec=pltpu.PrefetchScalarGridSpec(
            num_scalar_prefetch=0,
            grid=grid,
            in_specs=[
                pl.BlockSpec((tm, tk), lambda i, k: (i, k)),            # A
                pl.BlockSpec((tk, cout_pad), lambda i, k: (k, 0)),      # XW
                pl.BlockSpec((1, cout_pad), lambda i, k: (0, 0)),       # bias
            ],
            out_specs=pl.BlockSpec((tm, cout_pad), lambda i, k: (i, 0)),
            scratch_shapes=[pltpu.VMEM((tm, cout_pad), jnp.float32)],
        ),
        compiler_params=pltpu.CompilerParams(
            dimension_semantics=("parallel", "arbitrary"),
            vmem_limit_bytes=vmem,
        ),
    )(a, xw, b)


# ------------------------- plain-JAX glue (setup) -------------------------

def build_gcn_norm_adjacency(edge_index, num_nodes, n_pad, dtype=jnp.bfloat16):
    """Dense D^-1/2 (A + I) D^-1/2, scattered directly into a zero-padded
    (n_pad, n_pad) buffer at `dtype` (no post-hoc pad/cast pass).  Messages
    flow src -> dst (out[dst] += norm * x[src]), matching PyG GCNConv."""
    src, dst = edge_index[0], edge_index[1]
    loop = jnp.arange(num_nodes, dtype=src.dtype)
    src = jnp.concatenate([src, loop])
    dst = jnp.concatenate([dst, loop])
    ones = jnp.ones(src.shape[0], dtype=jnp.float32)
    deg = jnp.zeros(num_nodes, jnp.float32).at[dst].add(ones)
    dinv = jnp.where(deg > 0, jax.lax.rsqrt(deg), 0.0)
    norm = (dinv[dst] * dinv[src]).astype(dtype)
    # A_norm[dst, src] = norm so that (A_norm @ X)[dst] = sum_src norm * X[src]
    a = jnp.zeros((n_pad, n_pad), dtype).at[dst, src].add(norm)
    return a


def gnfe_forward(x, edge_index, weight, bias, *, force_reduction=False,
                 tm=None, tk=None):
    """relu( A_norm @ X @ W + b ) — GNFE forward pass."""
    n, _ = x.shape
    cout = weight.shape[1]
    cout_pad = _ceil_to(cout, LANE)

    plan = None if force_reduction else _plan_rowslab(n, cout_pad)
    if plan is not None:
        row_tile, n_pad = plan
        use_reduction = False
    else:
        row_tile, red_tile, n_pad = _plan_reduction(n, cout_pad, tm, tk)
        use_reduction = True

    # A_norm built directly at padded shape in bf16 (dominant HBM stream).
    a_p = build_gcn_norm_adjacency(edge_index, n, n_pad, jnp.bfloat16)

    # Precompute XW in f32 (tiny N*Cin*Cout matmul), pad + cast to bf16.
    xw = x.astype(jnp.float32) @ weight.astype(jnp.float32)
    xw_p = jnp.zeros((n_pad, cout_pad), jnp.bfloat16).at[:n, :cout].set(
        xw.astype(jnp.bfloat16))
    b_p = jnp.zeros((1, cout_pad), jnp.float32).at[0, :cout].set(
        bias.astype(jnp.float32))

    if use_reduction:
        out = _call_reduction(a_p, xw_p, b_p, n_pad, cout_pad, row_tile,
                              red_tile)
    else:
        out = _call_rowslab(a_p, xw_p, b_p, n_pad, cout_pad, row_tile)
    return out[:n, :cout]


# --------------------------------- main -----------------------------------

if __name__ == "__main__":
    key = jax.random.PRNGKey(0)
    k_x, k_e, k_w, k_b = jax.random.split(key, 4)

    num_nodes = 512
    in_channels = 8
    out_channels = 32
    num_edges = 2048

    # deterministic synthetic graph + features
    x = jax.random.normal(k_x, (num_nodes, in_channels), jnp.float32)
    edge_index = jax.random.randint(k_e, (2, num_edges), 0, num_nodes,
                                    jnp.int32)

    # deterministic parameter init (glorot-ish weight, small random bias)
    limit = (6.0 / (in_channels + out_channels)) ** 0.5
    weight = jax.random.uniform(
        k_w, (in_channels, out_channels), jnp.float32, -limit, limit)
    bias = 0.01 * jax.random.normal(k_b, (out_channels,), jnp.float32)

    # pure-JAX f32 reference
    a_ref = build_gcn_norm_adjacency(edge_index, num_nodes, num_nodes,
                                     jnp.float32)
    ref = jnp.maximum(a_ref @ (x @ weight) + bias[None, :], 0.0)

    # Primary path: 1-D row-slab kernel (auto-selected at this size).
    out = jax.block_until_ready(gnfe_forward(x, edge_index, weight, bias))
    assert out.shape == (num_nodes, out_channels)
    assert jnp.allclose(out, ref, atol=2e-2, rtol=2e-2), (
        float(jnp.max(jnp.abs(out - ref))))

    # Also exercise the 2-D reduction fallback (used for very large graphs).
    out2 = jax.block_until_ready(
        gnfe_forward(x, edge_index, weight, bias, force_reduction=True,
                     tm=256, tk=128))
    assert out2.shape == (num_nodes, out_channels)
    assert jnp.allclose(out2, ref, atol=2e-2, rtol=2e-2), (
        float(jnp.max(jnp.abs(out2 - ref))))

    print("KERNEL_OK")
</pallas_src>

<mosaic_0001>
module attributes {stable_mosaic.version = 11 : i64} {
  func.func @gnfe_rowslab_kernel(%arg0: i32, %arg1: memref<256x512xbf16, #tpu.memory_space<vmem>>, %arg2: memref<512x128xbf16, #tpu.memory_space<vmem>>, %arg3: memref<1x128xf32, #tpu.memory_space<vmem>>, %arg4: memref<256x128xf32, #tpu.memory_space<vmem>>) attributes {dimension_semantics = [#tpu.dimension_semantics<parallel>], iteration_bounds = array<i64: 2>, scalar_prefetch = 0 : i64, scratch_operands = 0 : i64, tpu.core_type = #tpu.core_type<tc>, window_params = [{transform_indices = @transform_0, window_bounds = array<i64: 256, 512>}, {pipeline_mode = #tpu.pipeline_mode<synchronous>, transform_indices = @transform_1, window_bounds = array<i64: 512, 128>}, {pipeline_mode = #tpu.pipeline_mode<synchronous>, transform_indices = @transform_2, window_bounds = array<i64: 1, 128>}, {transform_indices = @transform_3, window_bounds = array<i64: 256, 128>}]} {
    %c0 = arith.constant 0 : index
    %c0_0 = arith.constant 0 : index
    %0 = vector.load %arg1[%c0, %c0_0] : memref<256x512xbf16, #tpu.memory_space<vmem>>, vector<256x512xbf16>
    %c0_1 = arith.constant 0 : index
    %c0_2 = arith.constant 0 : index
    %1 = vector.load %arg2[%c0_1, %c0_2] : memref<512x128xbf16, #tpu.memory_space<vmem>>, vector<512x128xbf16>
    %cst = arith.constant dense<0.000000e+00> : vector<256x128xf32>
    %2 = tpu.matmul %0, %1, %cst {dimension_numbers = #tpu.dot_dimension_numbers<[1], [0], [0], [1], [0, 0, 1, 1], [], []>} : vector<256x512xbf16>, vector<512x128xbf16>, vector<256x128xf32> -> vector<256x128xf32>
    %c0_3 = arith.constant 0 : index
    %c0_4 = arith.constant 0 : index
    %3 = vector.load %arg3[%c0_3, %c0_4] : memref<1x128xf32, #tpu.memory_space<vmem>>, vector<1x128xf32>
    %4 = vector.broadcast %3 : vector<1x128xf32> to vector<256x128xf32>
    %5 = arith.addf %2, %4 : vector<256x128xf32>
    %cst_5 = arith.constant 0.000000e+00 : f32
    %6 = vector.broadcast %cst_5 : f32 to vector<256x128xf32>
    %7 = arith.maximumf %5, %6 : vector<256x128xf32>
    %c0_6 = arith.constant 0 : index
    %c0_7 = arith.constant 0 : index
    %8 = vector.load %arg4[%c0_6, %c0_7] : memref<256x128xf32, #tpu.memory_space<vmem>>, vector<256x128xf32>
    tpu.vector_store %arg4[%c0_6, %c0_7], %7 {strides = array<i32>} : memref<256x128xf32, #tpu.memory_space<vmem>>, vector<256x128xf32>,
    return
  }
  func.func @transform_0(%arg0: i32) -> (i32, i32) {
    %c0_i32 = arith.constant 0 : i32
    %c0_i32_0 = arith.constant 0 : i32
    return %arg0, %c0_i32 : i32, i32
  }
  func.func @transform_1(%arg0: i32) -> (i32, i32) {
    %c0_i32 = arith.constant 0 : i32
    %c0_i32_0 = arith.constant 0 : i32
    %c0_i32_1 = arith.constant 0 : i32
    return %c0_i32, %c0_i32_0 : i32, i32
  }
  func.func @transform_2(%arg0: i32) -> (i32, i32) {
    %c0_i32 = arith.constant 0 : i32
    %c0_i32_0 = arith.constant 0 : i32
    %c0_i32_1 = arith.constant 0 : i32
    return %c0_i32, %c0_i32_0 : i32, i32
  }
  func.func @transform_3(%arg0: i32) -> (i32, i32) {
    %c0_i32 = arith.constant 0 : i32
    %c0_i32_0 = arith.constant 0 : i32
    return %arg0, %c0_i32 : i32, i32
  }
}

</mosaic_0001>

<bundles_post_ra>
// kernel: tpu_custom_call.1
= control target key start
LH: loop header
LB: loop body
LE: loop exit
PB: predicated region body
PF: predicated region fallthrough
CT: control target
= control target key end

     0   :  { %8 = vsyncpa [#allocation3], 0  ;;  %s2369_s0 = inlined_call_operand.hbm [shape: bf16[512,512], index: 0, kind: input, shape index: {}]   ;;  %s2370_s1 = inlined_call_operand.hbm [shape: bf16[512,128], index: 1, kind: input, shape index: {}]   ;;  %s2371_s2 = inlined_call_operand.vmem [shape: f32[1,128], index: 2, kind: input, shape index: {}]   ;;  %s2372_s3 = inlined_call_operand.hbm [shape: f32[512,128], index: 3, kind: output, shape index: {}]  }
   0x1   :  { %10 = vsyncpa [#allocation3 + $0x1], 0 }
   0x2   :  { %11 = vsyncpa [#allocation6], 0 }
   0x3   :  { %12 = vsyncpa [#allocation4], 0 }
   0x4   :  { %14 = vsyncpa [#allocation4 + $0x1], 0  ;;  %s2029_s12 = smov 0   ;;  %s2031_s13 = smov 0  }
   0x5   :  { %s2033_s14 = smov 0   ;;  %s2035_s15 = smov 0  }
   0x6 LB: > { %s2050_s16 = sadd.s32 4294967295, %s1998_s15   ;;  %s1338_s17 = sadd.s32 4294967294, %s1998_s15   ;;  %s1998_s15 = sphi %s2035_s15, %s2392_s15   ;;  %s1994_s14 = sphi %s2033_s14, %s2391_s14   ;;  %s1990_s13 = sphi %s2031_s13, %s2390_s13   ;;  %s1986_s12 = sphi %s2029_s12, %s2389_s12  }
   0x7   : > { %p40_p0 = scmp.ne.s32.totalorder %s1990_s13, %s1986_s12  ;;  %p2373_p1 = scmp.eq.s32.totalorder %s2050_s16, 0 }
   0x8   : > { %p112_p3 = scmp.eq.s32.totalorder %s1338_s17, 1  ;;  %p1339_p5 = scmp.ge.s32.totalorder %s1998_s15, 1 }
   0x9   : > { %p2059_p4 = por %p2373_p1, %p40_p0  ;;  %p119_p7 = scmp.lt.s32.totalorder %s1998_s15, 3 }
   0xa   : > { %p2064_p6 = por %p112_p3, %p40_p0  ;;  %s2000_s21 = smov [#allocation5]  }
   0xb   : > { %s2376_s18 = scalar_select %p2059_p4, 1, 0 }
   0xc   : > { %s2377_s19 = scalar_select %p2064_p6, 1, 0 }
   0xd   : > { %p2069_p8 = pnand %p1339_p5, %p119_p7  ;;  %s131_s22 = sshll.u32 %s2000_s21, 4  ;;  %s2073_s22 = int_to_ptr.vmem [resolvable:$true] %s131_s22 }
   0xe   : > { %s2085_s24 = sadd.s32 1, %s1998_s15   ;;  %s27_s25 = sadd.s32 1, %s1994_s14 }
   0xf   : > { %s2378_s20 = scalar_select %p2069_p8, 1, 0 }
  0x10   : > { %p1687_p9 = pneg %p2069_p8  ;;  %s24_s26 = ssub.s32 %s1998_s15, %s2085_s24 }
  0x11   : > { %s1870_s29 = scalar_lea.hbm %s2370_s1, 4096 }
  0x12   : > { %p2080_p11 = pnand %p1687_p9, %p2373_p1  ;;  %p1871_p12 = scmp.ne.s32.totalorder %s2370_s1, %s1870_s29 }
  0x13   : > { %p1877_p5 = scmp.lt.u32.totalorder %s1870_s29, %s2370_s1 }
  0x14   : > { %p1872_p13 = pneg %p2080_p11 }
  0x16   : > { %p1873_p0 = pnand %p1872_p13, %p1871_p12 }
  0x18   : > { %p1874_p3 = pneg %p1873_p0 }
  0x1a   : > { %p1879_p7 = pnand %p1877_p5, %p1874_p3 }
  0x1c   : > { %1882 = shalt.err (!%p1879_p7)
}
  0x1d   : > { %s1883_s7 = scalar_lea.vmem %s2073_s22, 4096  ;;  %p1891_p2 = scmp.lt.s32.totalorder %s2073_s22, %s2073_s22 }
  0x1e   : > { %p1884_p9 = scmp.ne.s32.totalorder %s2073_s22, %s1883_s7  ;;  %p1892_p6 = scmp.lt.s32.totalorder %s1883_s7, %s1883_s7 }
  0x20   : > { %p1886_p10 = pnand %p1884_p9, %p1872_p13  ;;  %p1893_p4 = por %p1892_p6, %p1891_p2 }
  0x22   : > { %p1887_p1 = pneg %p1886_p10 }
  0x24   : > { %p1894_p8 = pnand %p1893_p4, %p1887_p1 }
  0x26   : > { %1897 = shalt.err (!%p1894_p8)
}
  0x27   : > { %s2001_s8 = smov 64   ;;  %s2002_s9 = smov 4  }
  0x28   : > { %1690 = dma.hbm_to_vmem [thread:$0]  (!%p2080_p11), %s2370_s1, 4096, %s2073_s22, [#allocation6], %s2001_s8, %s2001_s8, %s2002_s9  }
  0x29   : > { %p25_p2 = scmp.eq.s32.totalorder %s24_s26, 0  ;;  %p34_p1 = scmp.ne.s32.totalorder %s1994_s14, %s1990_s13 }
  0x2a   : > { %p35_p4 = scmp.eq.s32.totalorder %s1998_s15, 0  ;;  %p1700_p6 = scmp.lt.s32.totalorder %s1998_s15, 2 }
  0x2b   : > { %s2116_s17 = scalar_select %p25_p2, %s1994_s14, %s27_s25  }
  0x2c   : > { %p36_p8 = por %p35_p4, %p34_p1  ;;  %p2380_p10 = scmp.eq.s32.totalorder %s2050_s16, 1 }
  0x2d   : > { %s148_s27 = sand.u32 1, %s1994_s14   ;;  %s1453_s28 = sshll.u32 %s1998_s15, 13 }
  0x2e   : > { %p2120_p12 = por %p2380_p10, %p34_p1  ;;  %s1342_s29 = sshll.u32 %s148_s27, 9 }
  0x2f   : > { %s2129_s4 = scalar_lea.hbm %s2369_s0, %s1453_s28  ;;  %s152_s22 = scalar_lea.vmem [#allocation2], %s1342_s29 }
  0x30   : > { %s160_s25 = sshll.u32 %s152_s22, 4  ;;  %p2131_p11 = pnand %p1700_p6, %p36_p8  ;;  %s2135_s25 = int_to_ptr.vmem [resolvable:$true] %s160_s25 }
  0x31   : > { %s2137_s5 = scalar_lea.sflag [#allocation3], %s148_s27  ;;  %s1898_s6 = scalar_lea.hbm %s2129_s4, 8192 }
  0x32   : > { %p1899_p13 = scmp.ne.s32.totalorder %s2129_s4, %s1898_s6  ;;  %p1900_p0 = pneg %p2131_p11 }
  0x33   : > { %s1903_s9 = scalar_lea.hbm %s2369_s0, 16384  ;;  %p1904_p7 = scmp.lt.u32.totalorder %s2129_s4, %s2369_s0 }
  0x34   : > { %p1901_p3 = pnand %p1900_p0, %p1899_p13  ;;  %p1905_p9 = scmp.lt.u32.totalorder %s1903_s9, %s1898_s6 }
  0x35   : > { %p1907_p1 = scmp.lt.u32.totalorder %s1898_s6, %s2129_s4 }
  0x36   : > { %p1902_p5 = pneg %p1901_p3  ;;  %p1906_p2 = por %p1905_p9, %p1904_p7 }
  0x38   : > { %p1908_p4 = por %p1907_p1, %p1906_p2 }
  0x3a   : > { %p1909_p6 = pnand %p1908_p4, %p1902_p5 }
  0x3c   : > { %1912 = shalt.err (!%p1909_p6)
}
  0x3d   : > { %s1913_s27 = scalar_lea.vmem %s2135_s25, 8192  ;;  %s2003_s28 = smov [#allocation2]  }
  0x3e   : > { %p1914_p8 = scmp.ne.s32.totalorder %s2135_s25, %s1913_s27  ;;  %s1918_s29 = sshll.u32 %s2003_s28, 4  ;;  %s1919_s29 = int_to_ptr.vmem [resolvable:$false] %s1918_s29 }
  0x3f   : > { %s1920_s23 = scalar_lea.vmem %s1919_s29, 16384  ;;  %p1921_p3 = scmp.lt.s32.totalorder %s2135_s25, %s1919_s29 }
  0x40   : > { %p1916_p10 = pnand %p1914_p8, %p1900_p0  ;;  %p1922_p7 = scmp.lt.s32.totalorder %s1920_s23, %s1913_s27 }
  0x42   : > { %p1917_p13 = pneg %p1916_p10  ;;  %p1923_p9 = por %p1922_p7, %p1921_p3 }
  0x44   : > { %p1924_p2 = pnand %p1923_p9, %p1917_p13 }
  0x46   : > { %1927 = shalt.err (!%p1924_p2)
}
  0x47   : > { %s2004_s30 = smov 256   ;;  %s2005_s22 = smov 16  }
  0x48   : > { %1694 = dma.hbm_to_vmem [thread:$0]  (!%p2131_p11), %s2129_s4, 8192, %s2135_s25, %s2137_s5, %s2004_s30, %s2004_s30, %s2005_s22  }
  0x49   : > { %p2383_p0 = scmp.ne.s32.totalorder %s2378_s20, 0 }
  0x4a   : > { %s2168_s6 = sand.u32 (!%p2383_p0), 1, %s1990_s13   ;;  %p2384_p5 = scmp.ne.s32.totalorder (!%p2383_p0), %s2376_s18, 0 }
  0x4b   : > { %172 = sbr.rel (%p2383_p0) target bundleno = 478 (0x1de), region = 32  ;;  %s1347_s7 = sshll.u32 (!%p2383_p0), %s2168_s6, 9 }
  0x4c   : > { %s175_s8 = scalar_lea.sflag (!%p2383_p0), [#allocation3], %s2168_s6  ;;  %s2172_s9 = scalar_lea.vmem (!%p2383_p0), [#allocation2], %s1347_s7 }
  0x52   : > { %1973 = dma.done.wait (%p2384_p5), %s175_s8, 8192  }
  0x53   : > { %1975 = vsyncadd (%p2384_p5), %s175_s8, 4294959104  ;;  %p2385_p11 = scmp.eq.s32.totalorder %s2050_s16, 0 }
  0x55   : > { %1977 = dma.done.wait (%p2385_p11), [#allocation6], 4096   ;;  %p2386_p1 = pmov %p2385_p11 }
  0x56   : > { %v1742_v0 = vld [vmem:[#allocation5 + $0x40] sm:$0xff]   ;;  %v1746_v4 = vld [vmem:[#allocation5 + $0x48] sm:$0xff]   ;;  %v1750_v8 = vld [vmem:[#allocation5 + $0x50] sm:$0xff]   ;;  %s1349_s4 = sshll.u32 %s2168_s6, 8  ;;  %s1454_s26 = sshll.u32 %s2050_s16, 12 }
  0x57   : > { %1979 = vsyncadd (%p2386_p1), [#allocation6], 4294963200  ;;  %v1743_v1 = vld [vmem:[#allocation5 + $0xc0] sm:$0xff]   ;;  %1455 = vmatprep.subr.bf16.mxu0 %v1742_v0  ;;  %v1747_v5 = vld [vmem:[#allocation5 + $0xc8] sm:$0xff]   ;;  %s2254_s25 = scalar_lea.vmem [#allocation7], %s1349_s4  ;;  %s2321_s27 = scalar_lea.hbm %s2372_s3, %s1454_s26 }
  0x58   : > { %v1744_v2 = vld [vmem:[#allocation5] sm:$0xff]   ;;  %1567 = vmatprep.subr.bf16.mxu1 %v1743_v1  ;;  %v1748_v6 = vld [vmem:[#allocation5 + $0x8] sm:$0xff]   ;;  %v1751_v9 = vld [vmem:[#allocation5 + $0xd0] sm:$0xff]   ;;  %s1255_s5 = sshll.u32 %s2254_s25, 4  ;;  %s1242_s28 = scalar_lea.sflag [#allocation4], %s2168_s6  ;;  %s2323_s5 = int_to_ptr.vmem [resolvable:$true] %s1255_s5 }
  0x59   : > { %v1745_v3 = vld [vmem:[#allocation5 + $0x80] sm:$0xff]   ;;  %1456 = vmatpush3.bf16.msra.mxu0 %v1744_v2  ;;  %v1749_v7 = vld [vmem:[#allocation5 + $0x88] sm:$0xff]   ;;  %v1752_v10 = vld [vmem:[#allocation5 + $0x10] sm:$0xff]   ;;  %s1928_s29 = scalar_lea.vmem %s2323_s5, 4096  ;;  %s2006_s16 = smov [#allocation7]  }
  0x5a   : > { %1568 = vmatpush3.bf16.msra.mxu1 %v1745_v3  ;;  %1457 = vmatprep.subr.bf16.mxu0 %v1746_v4  ;;  %v1753_v11 = vld [vmem:[#allocation5 + $0x90] sm:$0xff]   ;;  %v1754_v12 = vld [vmem:[#allocation5 + $0x58] sm:$0xff]   ;;  %v1758_v16 = vld [vmem:[#allocation5 + $0x60] sm:$0xff]   ;;  %p1929_p4 = scmp.ne.s32.totalorder %s2323_s5, %s1928_s29  ;;  %s1932_s23 = sshll.u32 %s2006_s16, 4  ;;  %s1933_s23 = int_to_ptr.vmem [resolvable:$false] %s1932_s23 }
  0x5b   : > { %1569 = vmatprep.subr.bf16.mxu1 %v1747_v5  ;;  %v1755_v13 = vld [vmem:[#allocation5 + $0xd8] sm:$0xff]   ;;  %v1759_v17 = vld [vmem:[#allocation5 + $0xe0] sm:$0xff]   ;;  %v1762_v20 = vld [vmem:[#allocation5 + $0x68] sm:$0xff]   ;;  %s1934_s30 = scalar_lea.vmem %s1933_s23, 8192  ;;  %p1935_p10 = scmp.lt.s32.totalorder %s2323_s5, %s1933_s23 }
  0x5c   : > { %v1756_v14 = vld [vmem:[#allocation5 + $0x18] sm:$0xff]   ;;  %v1760_v18 = vld [vmem:[#allocation5 + $0x20] sm:$0xff]   ;;  %v1763_v21 = vld [vmem:[#allocation5 + $0xe8] sm:$0xff]   ;;  %p1930_p6 = pnand %p1929_p4, %p2120_p12  ;;  %p1936_p13 = scmp.lt.s32.totalorder %s1934_s30, %s1928_s29 }
  0x5d   : > { %1458 = vmatpush3.bf16.msra.mxu0 %v1748_v6  ;;  %v1757_v15 = vld [vmem:[#allocation5 + $0x98] sm:$0xff]   ;;  %v1761_v19 = vld [vmem:[#allocation5 + $0xa0] sm:$0xff]   ;;  %v1764_v22 = vld [vmem:[#allocation5 + $0x28] sm:$0xff]  }
  0x5e   : > { %1570 = vmatpush3.bf16.msra.mxu1 %v1749_v7  ;;  %1459 = vmatprep.subr.bf16.mxu0 %v1750_v8  ;;  %v1765_v23 = vld [vmem:[#allocation5 + $0xa8] sm:$0xff]   ;;  %v1766_v24 = vld [vmem:[#allocation5 + $0x70] sm:$0xff]   ;;  %v1770_v28 = vld [vmem:[#allocation5 + $0x78] sm:$0xff]   ;;  %p1931_p8 = pneg %p1930_p6  ;;  %p1937_p3 = por %p1936_p13, %p1935_p10 }
  0x5f   : > { %1571 = vmatprep.subr.bf16.mxu1 %v1751_v9  ;;  %v1767_v25 = vld [vmem:[#allocation5 + $0xf0] sm:$0xff]   ;;  %v1771_v29 = vld [vmem:[#allocation5 + $0xf8] sm:$0xff]  }
  0x60   : > { %v1768_v26 = vld [vmem:[#allocation5 + $0x30] sm:$0xff]   ;;  %v1772_v30 = vld [vmem:[#allocation5 + $0x38] sm:$0xff]   ;;  %p1938_p7 = pnand %p1937_p3, %p1931_p8 }
  0x61   : > { %1460 = vmatpush3.bf16.msra.mxu0 %v1752_v10  ;;  %v1769_v27 = vld [vmem:[#allocation5 + $0xb0] sm:$0xff]   ;;  %v1773_v31 = vld [vmem:[#allocation5 + $0xb8] sm:$0xff]  }
  0x62   : > { %1572 = vmatpush3.bf16.msra.mxu1 %v1753_v11  ;;  %1461 = vmatprep.subr.bf16.mxu0 %v1754_v12  ;;  %v1774_v32 = vld [vmem:[%s2172_s9] ss:$16 sps:$4 sm:$0xff]   ;;  %v1776_v33 = vld [vmem:[%s2172_s9 + $0x4] ss:$16 sps:$4 sm:$0xff]   ;;  %v1777_v34 = vld [vmem:[%s2172_s9 + $0x8] ss:$16 sps:$4 sm:$0xff]  }
  0x63   : > { %1573 = vmatprep.subr.bf16.mxu1 %v1755_v13  ;;  %v1779_v35 = vld [vmem:[%s2172_s9 + $0xc] ss:$16 sps:$4 sm:$0xff]   ;;  %887 = vmatprep.mubr.bf16.mxu0 %v1776_v33  ;;  %v1780_v36 = vld [vmem:[%s2172_s9 + $0x24] ss:$16 sps:$4 sm:$0xff]   ;;  %v1784_v38 = vld [vmem:[%s2172_s9 + $0x20] ss:$16 sps:$4 sm:$0xff]  }
  0x64   : > { %1048 = vmatprep.mubr.bf16.mxu1 %v1779_v35  ;;  %v1782_v37 = vld [vmem:[%s2172_s9 + $0x2c] ss:$16 sps:$4 sm:$0xff]   ;;  %v1785_v39 = vld [vmem:[%s2172_s9 + $0x28] ss:$16 sps:$4 sm:$0xff]   ;;  %v1786_v40 = vld [vmem:[%s2172_s9 + $0x44] ss:$16 sps:$4 sm:$0xff]  }
  0x65   : > { %1462 = vmatpush3.bf16.msra.mxu0 %v1756_v14  ;;  %v1788_v41 = vld [vmem:[%s2172_s9 + $0x4c] ss:$16 sps:$4 sm:$0xff]   ;;  %v1790_v42 = vld [vmem:[%s2172_s9 + $0x40] ss:$16 sps:$4 sm:$0xff]   ;;  %v1791_v43 = vld [vmem:[%s2172_s9 + $0x48] ss:$16 sps:$4 sm:$0xff]  }
  0x66   : > { %1574 = vmatpush3.bf16.msra.mxu1 %v1757_v15  ;;  %1463 = vmatprep.subr.bf16.mxu0 %v1758_v16  ;;  %v1792_v44 = vld [vmem:[%s2172_s9 + $0x64] ss:$16 sps:$4 sm:$0xff]   ;;  %v1794_v45 = vld [vmem:[%s2172_s9 + $0x6c] ss:$16 sps:$4 sm:$0xff]   ;;  %v1796_v46 = vld [vmem:[%s2172_s9 + $0x60] ss:$16 sps:$4 sm:$0xff]  }
  0x67   : > { %1575 = vmatprep.subr.bf16.mxu1 %v1759_v17  ;;  %v1797_v47 = vld [vmem:[%s2172_s9 + $0x68] ss:$16 sps:$4 sm:$0xff]   ;;  %v1798_v48 = vld [vmem:[%s2172_s9 + $0x84] ss:$16 sps:$4 sm:$0xff]   ;;  %v1800_v49 = vld [vmem:[%s2172_s9 + $0x8c] ss:$16 sps:$4 sm:$0xff]  }
  0x68   : > { %v1802_v50 = vld [vmem:[%s2172_s9 + $0x80] ss:$16 sps:$4 sm:$0xff]   ;;  %v1803_v51 = vld [vmem:[%s2172_s9 + $0x88] ss:$16 sps:$4 sm:$0xff]   ;;  %v1804_v52 = vld [vmem:[%s2172_s9 + $0xa4] ss:$16 sps:$4 sm:$0xff]  }
  0x69   : > { %1464 = vmatpush3.bf16.msra.mxu0 %v1760_v18  ;;  %v1806_v53 = vld [vmem:[%s2172_s9 + $0xac] ss:$16 sps:$4 sm:$0xff]   ;;  %v1808_v54 = vld [vmem:[%s2172_s9 + $0xa0] ss:$16 sps:$4 sm:$0xff]   ;;  %v1809_v55 = vld [vmem:[%s2172_s9 + $0xa8] ss:$16 sps:$4 sm:$0xff]  }
  0x6a   : > { %1576 = vmatpush3.bf16.msra.mxu1 %v1761_v19  ;;  %1465 = vmatprep.subr.bf16.mxu0 %v1762_v20  ;;  %v1810_v56 = vld [vmem:[%s2172_s9 + $0xc4] ss:$16 sps:$4 sm:$0xff]   ;;  %v1812_v57 = vld [vmem:[%s2172_s9 + $0xcc] ss:$16 sps:$4 sm:$0xff]   ;;  %v1814_v58 = vld [vmem:[%s2172_s9 + $0xc0] ss:$16 sps:$4 sm:$0xff]  }
  0x6b   : > { %1577 = vmatprep.subr.bf16.mxu1 %v1763_v21  ;;  %v1815_v59 = vld [vmem:[%s2172_s9 + $0xc8] ss:$16 sps:$4 sm:$0xff]   ;;  %v1816_v60 = vld [vmem:[%s2172_s9 + $0xe4] ss:$16 sps:$4 sm:$0xff]   ;;  %v1818_v61 = vld [vmem:[%s2172_s9 + $0xec] ss:$16 sps:$4 sm:$0xff]  }
  0x6c   : > { %v1820_v62 = vld [vmem:[%s2172_s9 + $0xe0] ss:$16 sps:$4 sm:$0xff]   ;;  %v1821_v63 = vld [vmem:[%s2172_s9 + $0xe8] ss:$16 sps:$4 sm:$0xff]   ;;  %v1822_v0 = vld [vmem:[%s2172_s9 + $0x104] ss:$16 sps:$4 sm:$0xff]  }
  0x6d   : > { %1466 = vmatpush3.bf16.msra.mxu0 %v1764_v22  ;;  %v1824_v1 = vld [vmem:[%s2172_s9 + $0x10c] ss:$16 sps:$4 sm:$0xff]   ;;  %v1826_v2 = vld [vmem:[%s2172_s9 + $0x100] ss:$16 sps:$4 sm:$0xff]   ;;  %v1827_v3 = vld [vmem:[%s2172_s9 + $0x108] ss:$16 sps:$4 sm:$0xff]  }
  0x6e   : > { %1578 = vmatpush3.bf16.msra.mxu1 %v1765_v23  ;;  %1467 = vmatprep.subr.bf16.mxu0 %v1766_v24  ;;  %v1828_v4 = vld [vmem:[%s2172_s9 + $0x124] ss:$16 sps:$4 sm:$0xff]   ;;  %v1830_v5 = vld [vmem:[%s2172_s9 + $0x12c] ss:$16 sps:$4 sm:$0xff]   ;;  %v1832_v6 = vld [vmem:[%s2172_s9 + $0x120] ss:$16 sps:$4 sm:$0xff]  }
  0x6f   : > { %1579 = vmatprep.subr.bf16.mxu1 %v1767_v25  ;;  %v1833_v7 = vld [vmem:[%s2172_s9 + $0x128] ss:$16 sps:$4 sm:$0xff]   ;;  %v1834_v8 = vld [vmem:[%s2172_s9 + $0x144] ss:$16 sps:$4 sm:$0xff]   ;;  %v1836_v9 = vld [vmem:[%s2172_s9 + $0x14c] ss:$16 sps:$4 sm:$0xff]  }
  0x70   : > { %v1838_v10 = vld [vmem:[%s2172_s9 + $0x140] ss:$16 sps:$4 sm:$0xff]   ;;  %v1839_v11 = vld [vmem:[%s2172_s9 + $0x148] ss:$16 sps:$4 sm:$0xff]   ;;  %v1840_v12 = vld [vmem:[%s2172_s9 + $0x164] ss:$16 sps:$4 sm:$0xff]  }
  0x71   : > { %1468 = vmatpush3.bf16.msra.mxu0 %v1768_v26  ;;  %v1842_v13 = vld [vmem:[%s2172_s9 + $0x16c] ss:$16 sps:$4 sm:$0xff]   ;;  %v1844_v14 = vld [vmem:[%s2172_s9 + $0x160] ss:$16 sps:$4 sm:$0xff]   ;;  %v1845_v15 = vld [vmem:[%s2172_s9 + $0x168] ss:$16 sps:$4 sm:$0xff]  }
  0x72   : > { %1580 = vmatpush3.bf16.msra.mxu1 %v1769_v27  ;;  %1469 = vmatprep.subr.bf16.mxu0 %v1770_v28  ;;  %v1846_v16 = vld [vmem:[%s2172_s9 + $0x184] ss:$16 sps:$4 sm:$0xff]   ;;  %v1848_v17 = vld [vmem:[%s2172_s9 + $0x18c] ss:$16 sps:$4 sm:$0xff]   ;;  %v1850_v18 = vld [vmem:[%s2172_s9 + $0x180] ss:$16 sps:$4 sm:$0xff]  }
  0x73   : > { %1581 = vmatprep.subr.bf16.mxu1 %v1771_v29  ;;  %v1851_v19 = vld [vmem:[%s2172_s9 + $0x188] ss:$16 sps:$4 sm:$0xff]   ;;  %v1852_v20 = vld [vmem:[%s2172_s9 + $0x1a4] ss:$16 sps:$4 sm:$0xff]   ;;  %v1854_v21 = vld [vmem:[%s2172_s9 + $0x1ac] ss:$16 sps:$4 sm:$0xff]  }
  0x74   : > { %v1856_v22 = vld [vmem:[%s2172_s9 + $0x1a0] ss:$16 sps:$4 sm:$0xff]   ;;  %v1857_v23 = vld [vmem:[%s2172_s9 + $0x1a8] ss:$16 sps:$4 sm:$0xff]   ;;  %v1858_v24 = vld [vmem:[%s2172_s9 + $0x1c4] ss:$16 sps:$4 sm:$0xff]  }
  0x75   : > { %1470 = vmatpush3.bf16.msra.mxu0 %v1772_v30  ;;  %v1860_v25 = vld [vmem:[%s2172_s9 + $0x1cc] ss:$16 sps:$4 sm:$0xff]   ;;  %v1862_v26 = vld [vmem:[%s2172_s9 + $0x1c0] ss:$16 sps:$4 sm:$0xff]   ;;  %v1863_v27 = vld [vmem:[%s2172_s9 + $0x1c8] ss:$16 sps:$4 sm:$0xff]  }
  0x76   : > { %1582 = vmatpush3.bf16.msra.mxu1 %v1773_v31  ;;  %v1864_v28 = vld [vmem:[%s2172_s9 + $0x1e4] ss:$16 sps:$4 sm:$0xff]   ;;  %v1866_v29 = vld [vmem:[%s2172_s9 + $0x1ec] ss:$16 sps:$4 sm:$0xff]   ;;  %v1868_v30 = vld [vmem:[%s2172_s9 + $0x1e0] ss:$16 sps:$4 sm:$0xff]  }
  0x77   : > { %v1869_v31 = vld [vmem:[%s2172_s9 + $0x1e8] ss:$16 sps:$4 sm:$0xff]  }
  0x78   : > { %888 = vmatmul.mubr.bf16.vlgmr.msra.gmra.mrb[0].mxu0 %v1774_v32 }
  0x79   : > { %1049 = vmatmul.mubr.bf16.vlgmr.msra.gmra.mrb[0].mxu1 %v1777_v34  ;;  %895 = vmatprep.mubr.bf16.mxu0 %v1780_v36  ;;  %v2249_v34 = vld [vmem:[%s2371_s2] ss:$0 sm:$0xff] }
  0x7a   : > { %1056 = vmatprep.mubr.bf16.mxu1 %v1782_v37 }
  0x80   : > { %896 = vmatmul.mubr.bf16.gmra.mrb[4].mxu0 %v1784_v38 }
  0x81   : > { %1057 = vmatmul.mubr.bf16.gmra.mrb[4].mxu1 %v1785_v39  ;;  %903 = vmatprep.mubr.bf16.mxu0 %v1786_v40 }
  0x82   : > { %1064 = vmatprep.mubr.bf16.mxu1 %v1788_v41 }
  0x88   : > { %904 = vmatmul.mubr.bf16.gmra.mrb[8].mxu0 %v1790_v42 }
  0x89   : > { %1065 = vmatmul.mubr.bf16.gmra.mrb[8].mxu1 %v1791_v43  ;;  %911 = vmatprep.mubr.bf16.mxu0 %v1792_v44 }
  0x8a   : > { %1072 = vmatprep.mubr.bf16.mxu1 %v1794_v45 }
  0x90   : > { %912 = vmatmul.mubr.bf16.gmra.mrb[12].mxu0 %v1796_v46 }
  0x91   : > { %1073 = vmatmul.mubr.bf16.gmra.mrb[12].mxu1 %v1797_v47  ;;  %919 = vmatprep.mubr.bf16.mxu0 %v1798_v48 }
  0x92   : > { %1080 = vmatprep.mubr.bf16.mxu1 %v1800_v49 }
  0x98   : > { %920 = vmatmul.mubr.bf16.gmra.mrb[16].mxu0 %v1802_v50 }
  0x99   : > { %1081 = vmatmul.mubr.bf16.gmra.mrb[16].mxu1 %v1803_v51  ;;  %927 = vmatprep.mubr.bf16.mxu0 %v1804_v52 }
  0x9a   : > { %1088 = vmatprep.mubr.bf16.mxu1 %v1806_v53 }
  0xa0   : > { %928 = vmatmul.mubr.bf16.gmra.mrb[20].mxu0 %v1808_v54 }
  0xa1   : > { %1089 = vmatmul.mubr.bf16.gmra.mrb[20].mxu1 %v1809_v55  ;;  %935 = vmatprep.mubr.bf16.mxu0 %v1810_v56 }
  0xa2   : > { %1096 = vmatprep.mubr.bf16.mxu1 %v1812_v57 }
  0xa8   : > { %936 = vmatmul.mubr.bf16.gmra.mrb[24].mxu0 %v1814_v58 }
  0xa9   : > { %1097 = vmatmul.mubr.bf16.gmra.mrb[24].mxu1 %v1815_v59  ;;  %943 = vmatprep.mubr.bf16.mxu0 %v1816_v60 }
  0xaa   : > { %1104 = vmatprep.mubr.bf16.mxu1 %v1818_v61 }
  0xb0   : > { %944 = vmatmul.mubr.bf16.gmra.mrb[28].mxu0 %v1820_v62 }
  0xb1   : > { %1105 = vmatmul.mubr.bf16.gmra.mrb[28].mxu1 %v1821_v63  ;;  %951 = vmatprep.mubr.bf16.mxu0 %v1822_v0 }
  0xb2   : > { %1112 = vmatprep.mubr.bf16.mxu1 %v1824_v1 }
  0xb8   : > { %952 = vmatmul.mubr.bf16.gmra.mrb[32].mxu0 %v1826_v2 }
  0xb9   : > { %1113 = vmatmul.mubr.bf16.gmra.mrb[32].mxu1 %v1827_v3  ;;  %959 = vmatprep.mubr.bf16.mxu0 %v1828_v4 }
  0xba   : > { %1120 = vmatprep.mubr.bf16.mxu1 %v1830_v5 }
  0xc0   : > { %960 = vmatmul.mubr.bf16.gmra.mrb[36].mxu0 %v1832_v6 }
  0xc1   : > { %1121 = vmatmul.mubr.bf16.gmra.mrb[36].mxu1 %v1833_v7  ;;  %967 = vmatprep.mubr.bf16.mxu0 %v1834_v8 }
  0xc2   : > { %1128 = vmatprep.mubr.bf16.mxu1 %v1836_v9 }
  0xc8   : > { %968 = vmatmul.mubr.bf16.gmra.mrb[40].mxu0 %v1838_v10 }
  0xc9   : > { %1129 = vmatmul.mubr.bf16.gmra.mrb[40].mxu1 %v1839_v11  ;;  %975 = vmatprep.mubr.bf16.mxu0 %v1840_v12 }
  0xca   : > { %1136 = vmatprep.mubr.bf16.mxu1 %v1842_v13 }
  0xd0   : > { %976 = vmatmul.mubr.bf16.gmra.mrb[44].mxu0 %v1844_v14 }
  0xd1   : > { %1137 = vmatmul.mubr.bf16.gmra.mrb[44].mxu1 %v1845_v15  ;;  %983 = vmatprep.mubr.bf16.mxu0 %v1846_v16 }
  0xd2   : > { %1144 = vmatprep.mubr.bf16.mxu1 %v1848_v17 }
  0xd8   : > { %984 = vmatmul.mubr.bf16.gmra.mrb[48].mxu0 %v1850_v18 }
  0xd9   : > { %1145 = vmatmul.mubr.bf16.gmra.mrb[48].mxu1 %v1851_v19  ;;  %991 = vmatprep.mubr.bf16.mxu0 %v1852_v20 }
  0xda   : > { %1152 = vmatprep.mubr.bf16.mxu1 %v1854_v21 }
  0xe0   : > { %992 = vmatmul.mubr.bf16.gmra.mrb[52].mxu0 %v1856_v22 }
  0xe1   : > { %1153 = vmatmul.mubr.bf16.gmra.mrb[52].mxu1 %v1857_v23  ;;  %999 = vmatprep.mubr.bf16.mxu0 %v1858_v24 }
  0xe2   : > { %1160 = vmatprep.mubr.bf16.mxu1 %v1860_v25 }
  0xe8   : > { %1000 = vmatmul.mubr.bf16.gmra.mrb[56].mxu0 %v1862_v26 }
  0xe9   : > { %1161 = vmatmul.mubr.bf16.gmra.mrb[56].mxu1 %v1863_v27  ;;  %1007 = vmatprep.mubr.bf16.mxu0 %v1864_v28 }
  0xea   : > { %1168 = vmatprep.mubr.bf16.mxu1 %v1866_v29 }
  0xf0   : > { %1008 = vmatmul.mubr.bf16.gmra.mrb[60].mxu0 %v1868_v30 }
  0xf1   : > { %1169 = vmatmul.mubr.bf16.gmra.mrb[60].mxu1 %v1869_v31 }
 0x14b   : > { %v1471_v32 = vpop.f32.mrb[0].mxu0 }
 0x14c   : > { %v1583_v33 = vpop.f32.mrb[0].mxu1  ;;  %v1472_v35 = vpop.f32.mrb[1].mxu0 }
 0x14d   : > { %v1473_v36 = vadd.f32 %v1472_v35, %v1471_v32  ;;  %v1584_v37 = vpop.f32.mrb[1].mxu1  ;;  %v1474_v38 = vpop.f32.mrb[2].mxu0 }
 0x14e   : > { %v1585_v39 = vadd.f32 %v1584_v37, %v1583_v33  ;;  %v1586_v40 = vpop.f32.mrb[2].mxu1  ;;  %v1475_v41 = vpop.f32.mrb[3].mxu0 }
 0x14f   : > { %v890_v42 = vadd.f32 %v1473_v36, %v2249_v34  ;;  %v1476_v43 = vadd.f32 %v1475_v41, %v1474_v38  ;;  %v1587_v44 = vpop.f32.mrb[3].mxu1 }
 0x150   : > { %v1588_v45 = vadd.f32 %v1587_v44, %v1586_v40 }
 0x151   : > { %v1051_v46 = vadd.f32 %v1585_v39, %v890_v42  ;;  %v893_v47 = vadd.f32 %v1476_v43, %v2249_v34 }
 0x153   : > { %v1177_v48 = vmax.f32 %v1051_v46, 0.0  ;;  %v1054_v49 = vadd.f32 %v1588_v45, %v893_v47  ;;  %v1477_v50 = vpop.f32.mrb[4].mxu0 }
 0x154   : > { %v1589_v51 = vpop.f32.mrb[4].mxu1  ;;  %v1478_v52 = vpop.f32.mrb[5].mxu0 }
 0x155   : > { %1209 = vst [vmem:[%s2254_s25] sm:$0xff] %v1177_v48  ;;  %v1178_v53 = vmax.f32 %v1054_v49, 0.0  ;;  %v1479_v54 = vadd.f32 %v1478_v52, %v1477_v50  ;;  %v1590_v55 = vpop.f32.mrb[5].mxu1  ;;  %v1480_v56 = vpop.f32.mrb[6].mxu0 }
 0x156   : > { %v1591_v57 = vadd.f32 %v1590_v55, %v1589_v51  ;;  %v1592_v58 = vpop.f32.mrb[6].mxu1  ;;  %v1481_v59 = vpop.f32.mrb[7].mxu0 }
 0x157   : > { %1210 = vst [vmem:[%s2254_s25 + $0x8] sm:$0xff] %v1178_v53  ;;  %v898_v60 = vadd.f32 %v1479_v54, %v2249_v34  ;;  %v1482_v61 = vadd.f32 %v1481_v59, %v1480_v56  ;;  %v1593_v62 = vpop.f32.mrb[7].mxu1 }
 0x158   : > { %v1594_v63 = vadd.f32 %v1593_v62, %v1592_v58 }
 0x159   : > { %v1059_v0 = vadd.f32 %v1591_v57, %v898_v60  ;;  %v901_v1 = vadd.f32 %v1482_v61, %v2249_v34 }
 0x15b   : > { %v1179_v2 = vmax.f32 %v1059_v0, 0.0  ;;  %v1062_v3 = vadd.f32 %v1594_v63, %v901_v1  ;;  %v1483_v4 = vpop.f32.mrb[8].mxu0 }
 0x15c   : > { %v1595_v5 = vpop.f32.mrb[8].mxu1  ;;  %v1484_v6 = vpop.f32.mrb[9].mxu0 }
 0x15d   : > { %1211 = vst [vmem:[%s2254_s25 + $0x10] sm:$0xff] %v1179_v2  ;;  %v1180_v7 = vmax.f32 %v1062_v3, 0.0  ;;  %v1485_v8 = vadd.f32 %v1484_v6, %v1483_v4  ;;  %v1596_v9 = vpop.f32.mrb[9].mxu1  ;;  %v1486_v10 = vpop.f32.mrb[10].mxu0 }
 0x15e   : > { %v1597_v11 = vadd.f32 %v1596_v9, %v1595_v5  ;;  %v1598_v12 = vpop.f32.mrb[10].mxu1  ;;  %v1487_v13 = vpop.f32.mrb[11].mxu0 }
 0x15f   : > { %1212 = vst [vmem:[%s2254_s25 + $0x18] sm:$0xff] %v1180_v7  ;;  %v906_v14 = vadd.f32 %v1485_v8, %v2249_v34  ;;  %v1488_v15 = vadd.f32 %v1487_v13, %v1486_v10  ;;  %v1599_v16 = vpop.f32.mrb[11].mxu1 }
 0x160   : > { %v1600_v17 = vadd.f32 %v1599_v16, %v1598_v12 }
 0x161   : > { %v1067_v18 = vadd.f32 %v1597_v11, %v906_v14  ;;  %v909_v19 = vadd.f32 %v1488_v15, %v2249_v34 }
 0x163   : > { %v1181_v20 = vmax.f32 %v1067_v18, 0.0  ;;  %v1070_v21 = vadd.f32 %v1600_v17, %v909_v19  ;;  %v1489_v22 = vpop.f32.mrb[12].mxu0 }
 0x164   : > { %v1601_v23 = vpop.f32.mrb[12].mxu1  ;;  %v1490_v24 = vpop.f32.mrb[13].mxu0 }
 0x165   : > { %1213 = vst [vmem:[%s2254_s25 + $0x20] sm:$0xff] %v1181_v20  ;;  %v1182_v25 = vmax.f32 %v1070_v21, 0.0  ;;  %v1491_v26 = vadd.f32 %v1490_v24, %v1489_v22  ;;  %v1602_v27 = vpop.f32.mrb[13].mxu1  ;;  %v1492_v28 = vpop.f32.mrb[14].mxu0 }
 0x166   : > { %v1603_v29 = vadd.f32 %v1602_v27, %v1601_v23  ;;  %v1604_v30 = vpop.f32.mrb[14].mxu1  ;;  %v1493_v31 = vpop.f32.mrb[15].mxu0 }
 0x167   : > { %1214 = vst [vmem:[%s2254_s25 + $0x28] sm:$0xff] %v1182_v25  ;;  %v914_v32 = vadd.f32 %v1491_v26, %v2249_v34  ;;  %v1494_v33 = vadd.f32 %v1493_v31, %v1492_v28  ;;  %v1605_v35 = vpop.f32.mrb[15].mxu1 }
 0x168   : > { %v1606_v36 = vadd.f32 %v1605_v35, %v1604_v30 }
 0x169   : > { %v1075_v37 = vadd.f32 %v1603_v29, %v914_v32  ;;  %v917_v38 = vadd.f32 %v1494_v33, %v2249_v34 }
 0x16b   : > { %v1183_v39 = vmax.f32 %v1075_v37, 0.0  ;;  %v1078_v40 = vadd.f32 %v1606_v36, %v917_v38  ;;  %v1495_v41 = vpop.f32.mrb[16].mxu0 }
 0x16c   : > { %v1607_v42 = vpop.f32.mrb[16].mxu1  ;;  %v1496_v43 = vpop.f32.mrb[17].mxu0 }
 0x16d   : > { %1215 = vst [vmem:[%s2254_s25 + $0x30] sm:$0xff] %v1183_v39  ;;  %v1184_v44 = vmax.f32 %v1078_v40, 0.0  ;;  %v1497_v45 = vadd.f32 %v1496_v43, %v1495_v41  ;;  %v1608_v46 = vpop.f32.mrb[17].mxu1  ;;  %v1498_v47 = vpop.f32.mrb[18].mxu0 }
 0x16e   : > { %v1609_v48 = vadd.f32 %v1608_v46, %v1607_v42  ;;  %v1610_v49 = vpop.f32.mrb[18].mxu1  ;;  %v1499_v50 = vpop.f32.mrb[19].mxu0 }
 0x16f   : > { %1216 = vst [vmem:[%s2254_s25 + $0x38] sm:$0xff] %v1184_v44  ;;  %v922_v51 = vadd.f32 %v1497_v45, %v2249_v34  ;;  %v1500_v52 = vadd.f32 %v1499_v50, %v1498_v47  ;;  %v1611_v53 = vpop.f32.mrb[19].mxu1 }
 0x170   : > { %v1612_v54 = vadd.f32 %v1611_v53, %v1610_v49 }
 0x171   : > { %v1083_v55 = vadd.f32 %v1609_v48, %v922_v51  ;;  %v925_v56 = vadd.f32 %v1500_v52, %v2249_v34 }
 0x173   : > { %v1185_v57 = vmax.f32 %v1083_v55, 0.0  ;;  %v1086_v58 = vadd.f32 %v1612_v54, %v925_v56  ;;  %v1501_v59 = vpop.f32.mrb[20].mxu0 }
 0x174   : > { %v1613_v60 = vpop.f32.mrb[20].mxu1  ;;  %v1502_v61 = vpop.f32.mrb[21].mxu0 }
 0x175   : > { %1217 = vst [vmem:[%s2254_s25 + $0x40] sm:$0xff] %v1185_v57  ;;  %v1186_v62 = vmax.f32 %v1086_v58, 0.0  ;;  %v1503_v63 = vadd.f32 %v1502_v61, %v1501_v59  ;;  %v1614_v0 = vpop.f32.mrb[21].mxu1  ;;  %v1504_v1 = vpop.f32.mrb[22].mxu0 }
 0x176   : > { %v1615_v2 = vadd.f32 %v1614_v0, %v1613_v60  ;;  %v1616_v3 = vpop.f32.mrb[22].mxu1  ;;  %v1505_v4 = vpop.f32.mrb[23].mxu0 }
 0x177   : > { %1218 = vst [vmem:[%s2254_s25 + $0x48] sm:$0xff] %v1186_v62  ;;  %v930_v5 = vadd.f32 %v1503_v63, %v2249_v34  ;;  %v1506_v6 = vadd.f32 %v1505_v4, %v1504_v1  ;;  %v1617_v7 = vpop.f32.mrb[23].mxu1 }
 0x178   : > { %v1618_v8 = vadd.f32 %v1617_v7, %v1616_v3 }
 0x179   : > { %v1091_v9 = vadd.f32 %v1615_v2, %v930_v5  ;;  %v933_v10 = vadd.f32 %v1506_v6, %v2249_v34 }
 0x17b   : > { %v1187_v11 = vmax.f32 %v1091_v9, 0.0  ;;  %v1094_v12 = vadd.f32 %v1618_v8, %v933_v10  ;;  %v1507_v13 = vpop.f32.mrb[24].mxu0 }
 0x17c   : > { %v1619_v14 = vpop.f32.mrb[24].mxu1  ;;  %v1508_v15 = vpop.f32.mrb[25].mxu0 }
 0x17d   : > { %1219 = vst [vmem:[%s2254_s25 + $0x50] sm:$0xff] %v1187_v11  ;;  %v1188_v16 = vmax.f32 %v1094_v12, 0.0  ;;  %v1509_v17 = vadd.f32 %v1508_v15, %v1507_v13  ;;  %v1620_v18 = vpop.f32.mrb[25].mxu1  ;;  %v1510_v19 = vpop.f32.mrb[26].mxu0 }
 0x17e   : > { %v1621_v20 = vadd.f32 %v1620_v18, %v1619_v14  ;;  %v1622_v21 = vpop.f32.mrb[26].mxu1  ;;  %v1511_v22 = vpop.f32.mrb[27].mxu0 }
 0x17f   : > { %1220 = vst [vmem:[%s2254_s25 + $0x58] sm:$0xff] %v1188_v16  ;;  %v938_v23 = vadd.f32 %v1509_v17, %v2249_v34  ;;  %v1512_v24 = vadd.f32 %v1511_v22, %v1510_v19  ;;  %v1623_v25 = vpop.f32.mrb[27].mxu1 }
 0x180   : > { %v1624_v26 = vadd.f32 %v1623_v25, %v1622_v21 }
 0x181   : > { %v1099_v27 = vadd.f32 %v1621_v20, %v938_v23  ;;  %v941_v28 = vadd.f32 %v1512_v24, %v2249_v34 }
 0x183   : > { %v1189_v29 = vmax.f32 %v1099_v27, 0.0  ;;  %v1102_v30 = vadd.f32 %v1624_v26, %v941_v28  ;;  %v1513_v31 = vpop.f32.mrb[28].mxu0 }
 0x184   : > { %v1625_v32 = vpop.f32.mrb[28].mxu1  ;;  %v1514_v33 = vpop.f32.mrb[29].mxu0 }
 0x185   : > { %1221 = vst [vmem:[%s2254_s25 + $0x60] sm:$0xff] %v1189_v29  ;;  %v1190_v35 = vmax.f32 %v1102_v30, 0.0  ;;  %v1515_v36 = vadd.f32 %v1514_v33, %v1513_v31  ;;  %v1626_v37 = vpop.f32.mrb[29].mxu1  ;;  %v1516_v38 = vpop.f32.mrb[30].mxu0 }
 0x186   : > { %v1627_v39 = vadd.f32 %v1626_v37, %v1625_v32  ;;  %v1628_v40 = vpop.f32.mrb[30].mxu1  ;;  %v1517_v41 = vpop.f32.mrb[31].mxu0 }
 0x187   : > { %1222 = vst [vmem:[%s2254_s25 + $0x68] sm:$0xff] %v1190_v35  ;;  %v946_v42 = vadd.f32 %v1515_v36, %v2249_v34  ;;  %v1518_v43 = vadd.f32 %v1517_v41, %v1516_v38  ;;  %v1629_v44 = vpop.f32.mrb[31].mxu1 }
 0x188   : > { %v1630_v45 = vadd.f32 %v1629_v44, %v1628_v40 }
 0x189   : > { %v1107_v46 = vadd.f32 %v1627_v39, %v946_v42  ;;  %v949_v47 = vadd.f32 %v1518_v43, %v2249_v34 }
 0x18b   : > { %v1191_v48 = vmax.f32 %v1107_v46, 0.0  ;;  %v1110_v49 = vadd.f32 %v1630_v45, %v949_v47  ;;  %v1519_v50 = vpop.f32.mrb[32].mxu0 }
 0x18c   : > { %v1631_v51 = vpop.f32.mrb[32].mxu1  ;;  %v1520_v52 = vpop.f32.mrb[33].mxu0 }
 0x18d   : > { %1223 = vst [vmem:[%s2254_s25 + $0x70] sm:$0xff] %v1191_v48  ;;  %v1192_v53 = vmax.f32 %v1110_v49, 0.0  ;;  %v1521_v54 = vadd.f32 %v1520_v52, %v1519_v50  ;;  %v1632_v55 = vpop.f32.mrb[33].mxu1  ;;  %v1522_v56 = vpop.f32.mrb[34].mxu0 }
 0x18e   : > { %v1633_v57 = vadd.f32 %v1632_v55, %v1631_v51  ;;  %v1634_v58 = vpop.f32.mrb[34].mxu1  ;;  %v1523_v59 = vpop.f32.mrb[35].mxu0 }
 0x18f   : > { %1224 = vst [vmem:[%s2254_s25 + $0x78] sm:$0xff] %v1192_v53  ;;  %v954_v60 = vadd.f32 %v1521_v54, %v2249_v34  ;;  %v1524_v61 = vadd.f32 %v1523_v59, %v1522_v56  ;;  %v1635_v62 = vpop.f32.mrb[35].mxu1 }
 0x190   : > { %v1636_v63 = vadd.f32 %v1635_v62, %v1634_v58 }
 0x191   : > { %v1115_v0 = vadd.f32 %v1633_v57, %v954_v60  ;;  %v957_v1 = vadd.f32 %v1524_v61, %v2249_v34 }
 0x193   : > { %v1193_v2 = vmax.f32 %v1115_v0, 0.0  ;;  %v1118_v3 = vadd.f32 %v1636_v63, %v957_v1  ;;  %v1525_v4 = vpop.f32.mrb[36].mxu0 }
 0x194   : > { %v1637_v5 = vpop.f32.mrb[36].mxu1  ;;  %v1526_v6 = vpop.f32.mrb[37].mxu0 }
 0x195   : > { %1225 = vst [vmem:[%s2254_s25 + $0x80] sm:$0xff] %v1193_v2  ;;  %v1194_v7 = vmax.f32 %v1118_v3, 0.0  ;;  %v1527_v8 = vadd.f32 %v1526_v6, %v1525_v4  ;;  %v1638_v9 = vpop.f32.mrb[37].mxu1  ;;  %v1528_v10 = vpop.f32.mrb[38].mxu0 }
 0x196   : > { %v1639_v11 = vadd.f32 %v1638_v9, %v1637_v5  ;;  %v1640_v12 = vpop.f32.mrb[38].mxu1  ;;  %v1529_v13 = vpop.f32.mrb[39].mxu0 }
 0x197   : > { %1226 = vst [vmem:[%s2254_s25 + $0x88] sm:$0xff] %v1194_v7  ;;  %v962_v14 = vadd.f32 %v1527_v8, %v2249_v34  ;;  %v1530_v15 = vadd.f32 %v1529_v13, %v1528_v10  ;;  %v1641_v16 = vpop.f32.mrb[39].mxu1 }
 0x198   : > { %v1642_v17 = vadd.f32 %v1641_v16, %v1640_v12 }
 0x199   : > { %v1123_v18 = vadd.f32 %v1639_v11, %v962_v14  ;;  %v965_v19 = vadd.f32 %v1530_v15, %v2249_v34 }
 0x19b   : > { %v1195_v20 = vmax.f32 %v1123_v18, 0.0  ;;  %v1126_v21 = vadd.f32 %v1642_v17, %v965_v19  ;;  %v1531_v22 = vpop.f32.mrb[40].mxu0 }
 0x19c   : > { %v1643_v23 = vpop.f32.mrb[40].mxu1  ;;  %v1532_v24 = vpop.f32.mrb[41].mxu0 }
 0x19d   : > { %1227 = vst [vmem:[%s2254_s25 + $0x90] sm:$0xff] %v1195_v20  ;;  %v1196_v25 = vmax.f32 %v1126_v21, 0.0  ;;  %v1533_v26 = vadd.f32 %v1532_v24, %v1531_v22  ;;  %v1644_v27 = vpop.f32.mrb[41].mxu1  ;;  %v1534_v28 = vpop.f32.mrb[42].mxu0 }
 0x19e   : > { %v1645_v29 = vadd.f32 %v1644_v27, %v1643_v23  ;;  %v1646_v30 = vpop.f32.mrb[42].mxu1  ;;  %v1535_v31 = vpop.f32.mrb[43].mxu0 }
 0x19f   : > { %1228 = vst [vmem:[%s2254_s25 + $0x98] sm:$0xff] %v1196_v25  ;;  %v970_v32 = vadd.f32 %v1533_v26, %v2249_v34  ;;  %v1536_v33 = vadd.f32 %v1535_v31, %v1534_v28  ;;  %v1647_v35 = vpop.f32.mrb[43].mxu1 }
 0x1a0   : > { %v1648_v36 = vadd.f32 %v1647_v35, %v1646_v30 }
 0x1a1   : > { %v1131_v37 = vadd.f32 %v1645_v29, %v970_v32  ;;  %v973_v38 = vadd.f32 %v1536_v33, %v2249_v34 }
 0x1a3   : > { %v1197_v39 = vmax.f32 %v1131_v37, 0.0  ;;  %v1134_v40 = vadd.f32 %v1648_v36, %v973_v38  ;;  %v1537_v41 = vpop.f32.mrb[44].mxu0 }
 0x1a4   : > { %v1649_v42 = vpop.f32.mrb[44].mxu1  ;;  %v1538_v43 = vpop.f32.mrb[45].mxu0 }
 0x1a5   : > { %1229 = vst [vmem:[%s2254_s25 + $0xa0] sm:$0xff] %v1197_v39  ;;  %v1198_v44 = vmax.f32 %v1134_v40, 0.0  ;;  %v1539_v45 = vadd.f32 %v1538_v43, %v1537_v41  ;;  %v1650_v46 = vpop.f32.mrb[45].mxu1  ;;  %v1540_v47 = vpop.f32.mrb[46].mxu0 }
 0x1a6   : > { %v1651_v48 = vadd.f32 %v1650_v46, %v1649_v42  ;;  %v1652_v49 = vpop.f32.mrb[46].mxu1  ;;  %v1541_v50 = vpop.f32.mrb[47].mxu0 }
 0x1a7   : > { %1230 = vst [vmem:[%s2254_s25 + $0xa8] sm:$0xff] %v1198_v44  ;;  %v978_v51 = vadd.f32 %v1539_v45, %v2249_v34  ;;  %v1542_v52 = vadd.f32 %v1541_v50, %v1540_v47  ;;  %v1653_v53 = vpop.f32.mrb[47].mxu1 }
 0x1a8   : > { %v1654_v54 = vadd.f32 %v1653_v53, %v1652_v49 }
 0x1a9   : > { %v1139_v55 = vadd.f32 %v1651_v48, %v978_v51  ;;  %v981_v56 = vadd.f32 %v1542_v52, %v2249_v34 }
 0x1ab   : > { %v1199_v57 = vmax.f32 %v1139_v55, 0.0  ;;  %v1142_v58 = vadd.f32 %v1654_v54, %v981_v56  ;;  %v1543_v59 = vpop.f32.mrb[48].mxu0 }
 0x1ac   : > { %v1655_v60 = vpop.f32.mrb[48].mxu1  ;;  %v1544_v61 = vpop.f32.mrb[49].mxu0 }
 0x1ad   : > { %1231 = vst [vmem:[%s2254_s25 + $0xb0] sm:$0xff] %v1199_v57  ;;  %v1200_v62 = vmax.f32 %v1142_v58, 0.0  ;;  %v1545_v63 = vadd.f32 %v1544_v61, %v1543_v59  ;;  %v1656_v0 = vpop.f32.mrb[49].mxu1  ;;  %v1546_v1 = vpop.f32.mrb[50].mxu0 }
 0x1ae   : > { %v1657_v2 = vadd.f32 %v1656_v0, %v1655_v60  ;;  %v1658_v3 = vpop.f32.mrb[50].mxu1  ;;  %v1547_v4 = vpop.f32.mrb[51].mxu0 }
 0x1af   : > { %1232 = vst [vmem:[%s2254_s25 + $0xb8] sm:$0xff] %v1200_v62  ;;  %v986_v5 = vadd.f32 %v1545_v63, %v2249_v34  ;;  %v1548_v6 = vadd.f32 %v1547_v4, %v1546_v1  ;;  %v1659_v7 = vpop.f32.mrb[51].mxu1 }
 0x1b0   : > { %v1660_v8 = vadd.f32 %v1659_v7, %v1658_v3 }
 0x1b1   : > { %v1147_v9 = vadd.f32 %v1657_v2, %v986_v5  ;;  %v989_v10 = vadd.f32 %v1548_v6, %v2249_v34 }
 0x1b3   : > { %v1201_v11 = vmax.f32 %v1147_v9, 0.0  ;;  %v1150_v12 = vadd.f32 %v1660_v8, %v989_v10  ;;  %v1549_v13 = vpop.f32.mrb[52].mxu0 }
 0x1b4   : > { %v1661_v14 = vpop.f32.mrb[52].mxu1  ;;  %v1550_v15 = vpop.f32.mrb[53].mxu0 }
 0x1b5   : > { %1233 = vst [vmem:[%s2254_s25 + $0xc0] sm:$0xff] %v1201_v11  ;;  %v1202_v16 = vmax.f32 %v1150_v12, 0.0  ;;  %v1551_v17 = vadd.f32 %v1550_v15, %v1549_v13  ;;  %v1662_v18 = vpop.f32.mrb[53].mxu1  ;;  %v1552_v19 = vpop.f32.mrb[54].mxu0 }
 0x1b6   : > { %v1663_v20 = vadd.f32 %v1662_v18, %v1661_v14  ;;  %v1664_v21 = vpop.f32.mrb[54].mxu1  ;;  %v1553_v22 = vpop.f32.mrb[55].mxu0 }
 0x1b7   : > { %1234 = vst [vmem:[%s2254_s25 + $0xc8] sm:$0xff] %v1202_v16  ;;  %v994_v23 = vadd.f32 %v1551_v17, %v2249_v34  ;;  %v1554_v24 = vadd.f32 %v1553_v22, %v1552_v19  ;;  %v1665_v25 = vpop.f32.mrb[55].mxu1 }
 0x1b8   : > { %v1666_v26 = vadd.f32 %v1665_v25, %v1664_v21 }
 0x1b9   : > { %v1155_v27 = vadd.f32 %v1663_v20, %v994_v23  ;;  %v997_v28 = vadd.f32 %v1554_v24, %v2249_v34 }
 0x1bb   : > { %v1203_v29 = vmax.f32 %v1155_v27, 0.0  ;;  %v1158_v30 = vadd.f32 %v1666_v26, %v997_v28  ;;  %v1555_v31 = vpop.f32.mrb[56].mxu0 }
 0x1bc   : > { %v1667_v32 = vpop.f32.mrb[56].mxu1  ;;  %v1556_v33 = vpop.f32.mrb[57].mxu0 }
 0x1bd   : > { %1235 = vst [vmem:[%s2254_s25 + $0xd0] sm:$0xff] %v1203_v29  ;;  %v1204_v35 = vmax.f32 %v1158_v30, 0.0  ;;  %v1557_v36 = vadd.f32 %v1556_v33, %v1555_v31  ;;  %v1668_v37 = vpop.f32.mrb[57].mxu1  ;;  %v1558_v38 = vpop.f32.mrb[58].mxu0 }
 0x1be   : > { %v1669_v39 = vadd.f32 %v1668_v37, %v1667_v32  ;;  %v1670_v40 = vpop.f32.mrb[58].mxu1  ;;  %v1559_v41 = vpop.f32.mrb[59].mxu0 }
 0x1bf   : > { %1236 = vst [vmem:[%s2254_s25 + $0xd8] sm:$0xff] %v1204_v35  ;;  %v1002_v42 = vadd.f32 %v1557_v36, %v2249_v34  ;;  %v1560_v43 = vadd.f32 %v1559_v41, %v1558_v38  ;;  %v1671_v44 = vpop.f32.mrb[59].mxu1 }
 0x1c0   : > { %v1672_v45 = vadd.f32 %v1671_v44, %v1670_v40 }
 0x1c1   : > { %v1163_v46 = vadd.f32 %v1669_v39, %v1002_v42  ;;  %v1005_v47 = vadd.f32 %v1560_v43, %v2249_v34 }
 0x1c3   : > { %v1205_v48 = vmax.f32 %v1163_v46, 0.0  ;;  %v1166_v49 = vadd.f32 %v1672_v45, %v1005_v47  ;;  %v1561_v50 = vpop.f32.mrb[60].mxu0 }
 0x1c4   : > { %v1673_v51 = vpop.f32.mrb[60].mxu1  ;;  %v1562_v52 = vpop.f32.mrb[61].mxu0 }
 0x1c5   : > { %1237 = vst [vmem:[%s2254_s25 + $0xe0] sm:$0xff] %v1205_v48  ;;  %v1206_v53 = vmax.f32 %v1166_v49, 0.0  ;;  %v1563_v54 = vadd.f32 %v1562_v52, %v1561_v50  ;;  %v1674_v55 = vpop.f32.mrb[61].mxu1  ;;  %v1564_v56 = vpop.f32.mrb[62].mxu0 }
 0x1c6   : > { %v1675_v57 = vadd.f32 %v1674_v55, %v1673_v51  ;;  %v1676_v58 = vpop.f32.mrb[62].mxu1  ;;  %v1565_v59 = vpop.f32.mrb[63].mxu0 }
 0x1c7   : > { %1238 = vst [vmem:[%s2254_s25 + $0xe8] sm:$0xff] %v1206_v53  ;;  %v1010_v60 = vadd.f32 %v1563_v54, %v2249_v34  ;;  %v1566_v61 = vadd.f32 %v1565_v59, %v1564_v56  ;;  %v1677_v62 = vpop.f32.mrb[63].mxu1 }
 0x1c8   : > { %v1678_v63 = vadd.f32 %v1677_v62, %v1676_v58 }
 0x1c9   : > { %v1171_v0 = vadd.f32 %v1675_v57, %v1010_v60  ;;  %v1013_v1 = vadd.f32 %v1566_v61, %v2249_v34 }
 0x1cb   : > { %v1207_v2 = vmax.f32 %v1171_v0, 0.0  ;;  %v1174_v3 = vadd.f32 %v1678_v63, %v1013_v1 }
 0x1cd   : > { %1239 = vst [vmem:[%s2254_s25 + $0xf0] sm:$0xff] %v1207_v2  ;;  %v1208_v4 = vmax.f32 %v1174_v3, 0.0 }
 0x1cf   : > { %1240 = vst [vmem:[%s2254_s25 + $0xf8] sm:$0xff] %v1208_v4 }
 0x1d0   : > { %1941 = shalt.err (!%p1938_p7)
}
 0x1d1   : > { %s1942_s22 = scalar_lea.hbm %s2321_s27, 4096  ;;  %s1946_s9 = scalar_lea.hbm %s2372_s3, 8192 }
 0x1d2   : > { %p1943_p9 = scmp.ne.s32.totalorder %s2321_s27, %s1942_s22  ;;  %p1947_p5 = scmp.lt.u32.totalorder %s2321_s27, %s2372_s3 }
 0x1d3   : > { %p1948_p11 = scmp.lt.u32.totalorder %s1946_s9, %s1942_s22  ;;  %p1950_p4 = scmp.lt.u32.totalorder %s1942_s22, %s2321_s27 }
 0x1d4   : > { %p1944_p2 = pnand %p1943_p9, %p2120_p12 }
 0x1d5   : > { %p1949_p1 = por %p1948_p11, %p1947_p5 }
 0x1d6   : > { %p1945_p0 = pneg %p1944_p2 }
 0x1d7   : > { %p1951_p6 = por %p1950_p4, %p1949_p1 }
 0x1d9   : > { %p1952_p8 = pnand %p1951_p6, %p1945_p0 }
 0x1db   : > { %1955 = shalt.err (!%p1952_p8)
}
 0x1dc   : > { %s2007_s4 = smov 128   ;;  %s2008_s25 = smov 8  }
 0x1dd   : > { %1685 = dma.vmem_to_hbm [thread:$0]  (%p2120_p12), %s2323_s5, 4096, %s2321_s27, %s1242_s28, %s2007_s4, %s2007_s4, %s2008_s25  }
 0x1de PF: > { %s1270_s26 = sand.u32 1, %s1986_s12   ;;  %p2387_p10 = scmp.ne.s32.totalorder %s2377_s19, 0 }
 0x1df   : > { %p2388_p13 = scmp.ge.s32.totalorder %s1998_s15, 2  ;;  %s1271_s10 = scalar_lea.sflag [#allocation4], %s1270_s26 }
 0x1e1   : > { %p1696_p3 = pnand %p2388_p13, %p2387_p10 }
 0x1e3   : > { %1981 = dma.done.wait (!%p1696_p3), %s1271_s10, 4096  }
 0x1e4   : > { %1983 = vsyncadd (!%p1696_p3), %s1271_s10, 4294963200  ;;  %p17_p7 = scmp.ge.s32.totalorder %s2085_s24, 4   ;;  %s2389_s12 = smov %s1990_s13 }
 0x1e5   : > { %s2390_s13 = smov %s1994_s14  ;;  %s2391_s14 = smov %s2116_s17 }
 0x1e6   : > { %s2392_s15 = smov %s2085_s24  ;;  %19 = sbr.rel (!%p17_p7) target bundleno = 6 (0x6), region = 81 }
 0x1ed   :  { %1276 = vsyncpa [#allocation3], 1 }
 0x1ee   :  { %1278 = vsyncpa [#allocation3 + $0x1], 1 }
 0x1ef   :  { %1279 = vsyncpa [#allocation6], 1 }
 0x1f0   :  { %1280 = vsyncpa [#allocation4], 1 }
 0x1f1   :  { %1282 = vsyncpa [#allocation4 + $0x1], 1 }

</bundles_post_ra>
